<compile_context>
chip_gen: v7x
topology: tpu7x:2x2x1
jax: 0.10.0
libtpu: 0.0.40
codegen_flags: <defaults>
</compile_context>

<pallas_src>
import functools

import jax
import jax.numpy as jnp
from jax import lax
from jax.experimental import pallas as pl
from jax.experimental.pallas import tpu as pltpu


# ----------------------------- model hyper-parameters -----------------------------
B = 2            # batch size
S = 8            # seq_len (cfg.model.denoiser.params.seq_len)
C = 16           # denoiser.input_dim (latent channels)
D_AUD_IN = 24    # raw cached audio feature dim
D_FEAT = 32      # encoded audio feature dim (at_feat / intent_feat)
H = 64           # denoiser hidden dim
NUM_STEPS = 4    # cfg.model.n_steps (num_inference_steps)
GUIDANCE_SCALE = 2.0   # cfg.model.guidance_scale
BS = B * S


# ----------------------------- fused forward kernel -----------------------------
def _gesture_lsm_kernel(dts_ref, temb_ref, alo_ref, ahi_ref, x0_ref, seed_ref,
                        wlo_ref, blo_ref, whi_ref, bhi_ref,
                        wx_ref, wa_ref, wi_ref, ws_ref, b1_ref, wo_ref, bo_ref,
                        lat_ref, at_ref, intent_ref,
                        *, guidance_scale, num_steps):
    """Modality encoder + CFG denoiser + full Euler ODE loop in one kernel body."""

    def mxu(a, w):
        # bf16 MXU inputs, f32 accumulation; elementwise math stays in f32.
        return jnp.dot(a.astype(jnp.bfloat16), w.astype(jnp.bfloat16),
                       preferred_element_type=jnp.float32)

    # ---- modality encoder (runs once) ----
    at_feat = jax.nn.gelu(mxu(alo_ref[...], wlo_ref[...]) + blo_ref[...],
                          approximate=True)                              # [BS, D_FEAT]
    intent_feat = jax.nn.gelu(mxu(ahi_ref[...], whi_ref[...]) + bhi_ref[...],
                              approximate=True)                          # [BS, D_FEAT]
    at_ref[...] = at_feat
    intent_ref[...] = intent_feat

    # ---- loop-invariant denoiser terms (hoisted out of the Euler loop) ----
    cond_add = mxu(at_feat, wa_ref[...]) + mxu(intent_feat, wi_ref[...])   # [BS, H]
    base_const = mxu(seed_ref[...], ws_ref[...]) + b1_ref[...]             # [BS, H]
    wx = wx_ref[...].astype(jnp.bfloat16)                                  # [C, H]
    wo = wo_ref[...].astype(jnp.bfloat16)                                  # [H, C]
    bo = bo_ref[...]                                                       # [1, C]

    # ---- Euler ODE loop (fully unrolled, x_t carried as a value) ----
    def euler_step(s, x):
        temb = temb_ref[s]                                                 # [1, H]
        base = (jnp.dot(x.astype(jnp.bfloat16), wx,
                        preferred_element_type=jnp.float32)
                + base_const + temb)                                       # [BS, H]
        h_uncond = jax.nn.gelu(base, approximate=True)
        h_cond = jax.nn.gelu(base + cond_add, approximate=True)
        # Classifier-free guidance folded into one output projection (output head is linear).
        h_blend = h_uncond + guidance_scale * (h_cond - h_uncond)
        speed = jnp.dot(h_blend.astype(jnp.bfloat16), wo,
                        preferred_element_type=jnp.float32) + bo           # [BS, C]
        return x + dts_ref[s] * speed                                      # Euler update

    lat_ref[...] = lax.fori_loop(0, num_steps, euler_step, x0_ref[...], unroll=True)


def fused_forward(dts, t_emb, audio_low, audio_high, x0, seed, params):
    kernel = functools.partial(_gesture_lsm_kernel,
                               guidance_scale=GUIDANCE_SCALE,
                               num_steps=NUM_STEPS)
    vmem = pl.BlockSpec(memory_space=pltpu.MemorySpace.VMEM)
    smem = pl.BlockSpec(memory_space=pltpu.MemorySpace.SMEM)
    return pl.pallas_call(
        kernel,
        out_shape=(
            jax.ShapeDtypeStruct((BS, C), jnp.float32),        # final latents (flat)
            jax.ShapeDtypeStruct((BS, D_FEAT), jnp.float32),   # at_feat
            jax.ShapeDtypeStruct((BS, D_FEAT), jnp.float32),   # intent_feat
        ),
        in_specs=[smem] + [vmem] * 16,
        out_specs=(vmem, vmem, vmem),
    )(dts, t_emb, audio_low, audio_high, x0, seed,
      params["W_enc_low"], params["b_enc_low"],
      params["W_enc_high"], params["b_enc_high"],
      params["Wx"], params["Wa"], params["Wi"], params["Ws"], params["b1"],
      params["Wo"], params["bo"])


# ----------------------------- parameter init (deterministic) -----------------------------
def init_params(key):
    keys = jax.random.split(key, 10)
    scale = 0.1
    return {
        # modality encoder
        "W_enc_low": scale * jax.random.normal(keys[0], (D_AUD_IN, D_FEAT), jnp.float32),
        "b_enc_low": jnp.zeros((1, D_FEAT), jnp.float32),
        "W_enc_high": scale * jax.random.normal(keys[1], (D_AUD_IN, D_FEAT), jnp.float32),
        "b_enc_high": jnp.zeros((1, D_FEAT), jnp.float32),
        # denoiser
        "Wx": scale * jax.random.normal(keys[2], (C, H), jnp.float32),
        "Wa": scale * jax.random.normal(keys[3], (D_FEAT, H), jnp.float32),
        "Wi": scale * jax.random.normal(keys[7], (D_FEAT, H), jnp.float32),
        "Ws": scale * jax.random.normal(keys[4], (C, H), jnp.float32),
        "b1": jnp.zeros((1, H), jnp.float32),
        "Wo": scale * jax.random.normal(keys[5], (H, C), jnp.float32),
        "bo": jnp.zeros((1, C), jnp.float32),
        # time-embedding MLP
        "Wt": scale * jax.random.normal(keys[6], (H, H), jnp.float32),
        "bt": jnp.zeros((1, H), jnp.float32),
    }


def sinusoidal_embedding(t, dim):
    """t: [N] -> [N, dim] sinusoidal embedding (glue, plain JAX)."""
    half = dim // 2
    freqs = jnp.exp(-jnp.log(10000.0) * jnp.arange(half, dtype=jnp.float32) / half)
    args = t[:, None] * freqs[None, :]
    return jnp.concatenate([jnp.sin(args), jnp.cos(args)], axis=-1)


# ----------------------------- GestureLSM forward -----------------------------
def gesture_lsm_forward(params, condition_dict, noise_key):
    """Mirrors GestureLSM.forward: encode modalities, then Euler-integrate the flow ODE."""
    y = condition_dict["y"]
    cached_audio_low = y["audio_low"]       # [B, S, D_AUD_IN]
    cached_audio_high = y["audio_high"]     # [B, S, D_AUD_IN]
    seed_vectors = y["seed"]                # [B, C, 1, S]

    return_dict = {"seed": seed_vectors}

    # ---- init noise, latent layout [B, C, 1, S] ----
    x_t = jax.random.normal(noise_key, (B, C, 1, S), jnp.float32)
    return_dict["init_noise"] = x_t

    # ---- timesteps / dt table (glue) ----
    epsilon = 1e-8
    timesteps = jnp.linspace(epsilon, 1.0 - epsilon, NUM_STEPS + 1).astype(jnp.float32)
    dts = timesteps[1:] - timesteps[:-1]                                   # [NUM_STEPS]
    delta_t = jnp.full((NUM_STEPS,), 1.0 / NUM_STEPS, jnp.float32)         # cond_time

    # per-step time + cond_time embedding -> [NUM_STEPS, 1, H]  (tiny MLP, plain-JAX glue)
    t_emb = sinusoidal_embedding(timesteps[:-1], H) + sinusoidal_embedding(delta_t, H)
    t_emb = jax.nn.gelu(t_emb @ params["Wt"] + params["bt"], approximate=True)
    t_emb = t_emb.reshape(NUM_STEPS, 1, H)

    # ---- flatten to kernel layout [B*S, *] ----
    audio_low_flat = cached_audio_low.reshape(BS, D_AUD_IN)
    audio_high_flat = cached_audio_high.reshape(BS, D_AUD_IN)
    x0_flat = jnp.transpose(x_t[:, :, 0, :], (0, 2, 1)).reshape(BS, C)
    seed_flat = jnp.transpose(seed_vectors[:, :, 0, :], (0, 2, 1)).reshape(BS, C)

    # ---- entire forward (encoder + denoiser + sampling loop) in one Pallas kernel ----
    x_final_flat, at_feat, intent_feat = fused_forward(
        dts, t_emb, audio_low_flat, audio_high_flat, x0_flat, seed_flat, params)

    return_dict["at_feat"] = at_feat.reshape(B, S, D_FEAT)
    return_dict["intent_feat"] = intent_feat.reshape(B, S, D_FEAT)
    latents = jnp.transpose(x_final_flat.reshape(B, S, C), (0, 2, 1)).reshape(B, C, 1, S)
    return_dict["latents"] = latents
    return return_dict


# ----------------------------- main -----------------------------
if __name__ == "__main__":
    key = jax.random.PRNGKey(0)
    k_param, k_low, k_high, k_seed, k_noise = jax.random.split(key, 5)

    params = init_params(k_param)

    condition_dict = {
        "y": {
            "audio_low": jax.random.normal(k_low, (B, S, D_AUD_IN), jnp.float32),
            "audio_high": jax.random.normal(k_high, (B, S, D_AUD_IN), jnp.float32),
            "seed": jax.random.normal(k_seed, (B, C, 1, S), jnp.float32),
        }
    }

    forward = jax.jit(gesture_lsm_forward)
    out = forward(params, condition_dict, k_noise)
    jax.block_until_ready(out["latents"])

    assert out["latents"].shape == (B, C, 1, S)
    assert out["at_feat"].shape == (B, S, D_FEAT)
    assert out["intent_feat"].shape == (B, S, D_FEAT)
    assert out["init_noise"].shape == (B, C, 1, S)
    assert bool(jnp.all(jnp.isfinite(out["latents"])))
    print("KERNEL_OK")
</pallas_src>

<mosaic_0001>
module attributes {stable_mosaic.version = 11 : i64} {
  func.func @_gesture_lsm_kernel(%arg0: memref<4xf32, #tpu.memory_space<smem>>, %arg1: memref<4x1x64xf32, #tpu.memory_space<vmem>>, %arg2: memref<16x24xf32, #tpu.memory_space<vmem>>, %arg3: memref<16x24xf32, #tpu.memory_space<vmem>>, %arg4: memref<16x16xf32, #tpu.memory_space<vmem>>, %arg5: memref<16x16xf32, #tpu.memory_space<vmem>>, %arg6: memref<24x32xf32, #tpu.memory_space<vmem>>, %arg7: memref<1x32xf32, #tpu.memory_space<vmem>>, %arg8: memref<24x32xf32, #tpu.memory_space<vmem>>, %arg9: memref<1x32xf32, #tpu.memory_space<vmem>>, %arg10: memref<16x64xf32, #tpu.memory_space<vmem>>, %arg11: memref<32x64xf32, #tpu.memory_space<vmem>>, %arg12: memref<32x64xf32, #tpu.memory_space<vmem>>, %arg13: memref<16x64xf32, #tpu.memory_space<vmem>>, %arg14: memref<1x64xf32, #tpu.memory_space<vmem>>, %arg15: memref<64x16xf32, #tpu.memory_space<vmem>>, %arg16: memref<1x16xf32, #tpu.memory_space<vmem>>, %arg17: memref<16x16xf32, #tpu.memory_space<vmem>>, %arg18: memref<16x32xf32, #tpu.memory_space<vmem>>, %arg19: memref<16x32xf32, #tpu.memory_space<vmem>>) attributes {dimension_semantics = [], scalar_prefetch = 0 : i64, scratch_operands = 0 : i64, tpu.core_type = #tpu.core_type<tc>} {
    %c0 = arith.constant 0 : index
    %c0_0 = arith.constant 0 : index
    %0 = vector.load %arg2[%c0, %c0_0] : memref<16x24xf32, #tpu.memory_space<vmem>>, vector<16x24xf32>
    %c0_1 = arith.constant 0 : index
    %c0_2 = arith.constant 0 : index
    %1 = vector.load %arg6[%c0_1, %c0_2] : memref<24x32xf32, #tpu.memory_space<vmem>>, vector<24x32xf32>
    %2 = arith.truncf %0 : vector<16x24xf32> to vector<16x24xbf16>
    %3 = arith.truncf %1 : vector<24x32xf32> to vector<24x32xbf16>
    %cst = arith.constant dense<0.000000e+00> : vector<16x32xf32>
    %4 = tpu.matmul %2, %3, %cst {dimension_numbers = #tpu.dot_dimension_numbers<[1], [0], [0], [1], [0, 0, 1, 1], [], []>} : vector<16x24xbf16>, vector<24x32xbf16>, vector<16x32xf32> -> vector<16x32xf32>
    %c0_3 = arith.constant 0 : index
    %c0_4 = arith.constant 0 : index
    %5 = vector.load %arg7[%c0_3, %c0_4] : memref<1x32xf32, #tpu.memory_space<vmem>>, vector<1x32xf32>
    %6 = vector.broadcast %5 : vector<1x32xf32> to vector<16x32xf32>
    %7 = arith.addf %4, %6 : vector<16x32xf32>
    %8 = arith.mulf %7, %7 : vector<16x32xf32>
    %9 = arith.mulf %7, %8 : vector<16x32xf32>
    %cst_5 = arith.constant 4.471500e-02 : f32
    %10 = vector.broadcast %cst_5 : f32 to vector<16x32xf32>
    %11 = arith.mulf %10, %9 : vector<16x32xf32>
    %12 = arith.addf %7, %11 : vector<16x32xf32>
    %cst_6 = arith.constant 0.797884583 : f32
    %13 = vector.broadcast %cst_6 : f32 to vector<16x32xf32>
    %14 = arith.mulf %13, %12 : vector<16x32xf32>
    %15 = math.tanh %14 : vector<16x32xf32>
    %cst_7 = arith.constant 1.000000e+00 : f32
    %16 = vector.broadcast %cst_7 : f32 to vector<16x32xf32>
    %17 = arith.addf %16, %15 : vector<16x32xf32>
    %cst_8 = arith.constant 5.000000e-01 : f32
    %18 = vector.broadcast %cst_8 : f32 to vector<16x32xf32>
    %19 = arith.mulf %18, %17 : vector<16x32xf32>
    %20 = arith.mulf %7, %19 : vector<16x32xf32>
    %c0_9 = arith.constant 0 : index
    %c0_10 = arith.constant 0 : index
    %21 = vector.load %arg3[%c0_9, %c0_10] : memref<16x24xf32, #tpu.memory_space<vmem>>, vector<16x24xf32>
    %c0_11 = arith.constant 0 : index
    %c0_12 = arith.constant 0 : index
    %22 = vector.load %arg8[%c0_11, %c0_12] : memref<24x32xf32, #tpu.memory_space<vmem>>, vector<24x32xf32>
    %23 = arith.truncf %21 : vector<16x24xf32> to vector<16x24xbf16>
    %24 = arith.truncf %22 : vector<24x32xf32> to vector<24x32xbf16>
    %cst_13 = arith.constant dense<0.000000e+00> : vector<16x32xf32>
    %25 = tpu.matmul %23, %24, %cst_13 {dimension_numbers = #tpu.dot_dimension_numbers<[1], [0], [0], [1], [0, 0, 1, 1], [], []>} : vector<16x24xbf16>, vector<24x32xbf16>, vector<16x32xf32> -> vector<16x32xf32>
    %c0_14 = arith.constant 0 : index
    %c0_15 = arith.constant 0 : index
    %26 = vector.load %arg9[%c0_14, %c0_15] : memref<1x32xf32, #tpu.memory_space<vmem>>, vector<1x32xf32>
    %27 = vector.broadcast %26 : vector<1x32xf32> to vector<16x32xf32>
    %28 = arith.addf %25, %27 : vector<16x32xf32>
    %29 = arith.mulf %28, %28 : vector<16x32xf32>
    %30 = arith.mulf %28, %29 : vector<16x32xf32>
    %cst_16 = arith.constant 4.471500e-02 : f32
    %31 = vector.broadcast %cst_16 : f32 to vector<16x32xf32>
    %32 = arith.mulf %31, %30 : vector<16x32xf32>
    %33 = arith.addf %28, %32 : vector<16x32xf32>
    %cst_17 = arith.constant 0.797884583 : f32
    %34 = vector.broadcast %cst_17 : f32 to vector<16x32xf32>
    %35 = arith.mulf %34, %33 : vector<16x32xf32>
    %36 = math.tanh %35 : vector<16x32xf32>
    %cst_18 = arith.constant 1.000000e+00 : f32
    %37 = vector.broadcast %cst_18 : f32 to vector<16x32xf32>
    %38 = arith.addf %37, %36 : vector<16x32xf32>
    %cst_19 = arith.constant 5.000000e-01 : f32
    %39 = vector.broadcast %cst_19 : f32 to vector<16x32xf32>
    %40 = arith.mulf %39, %38 : vector<16x32xf32>
    %41 = arith.mulf %28, %40 : vector<16x32xf32>
    %c0_20 = arith.constant 0 : index
    %c0_21 = arith.constant 0 : index
    %42 = vector.load %arg18[%c0_20, %c0_21] : memref<16x32xf32, #tpu.memory_space<vmem>>, vector<16x32xf32>
    tpu.vector_store %arg18[%c0_20, %c0_21], %20 {strides = array<i32>} : memref<16x32xf32, #tpu.memory_space<vmem>>, vector<16x32xf32>,
    %c0_22 = arith.constant 0 : index
    %c0_23 = arith.constant 0 : index
    %43 = vector.load %arg19[%c0_22, %c0_23] : memref<16x32xf32, #tpu.memory_space<vmem>>, vector<16x32xf32>
    tpu.vector_store %arg19[%c0_22, %c0_23], %41 {strides = array<i32>} : memref<16x32xf32, #tpu.memory_space<vmem>>, vector<16x32xf32>,
    %c0_24 = arith.constant 0 : index
    %c0_25 = arith.constant 0 : index
    %44 = vector.load %arg11[%c0_24, %c0_25] : memref<32x64xf32, #tpu.memory_space<vmem>>, vector<32x64xf32>
    %45 = arith.truncf %20 : vector<16x32xf32> to vector<16x32xbf16>
    %46 = arith.truncf %44 : vector<32x64xf32> to vector<32x64xbf16>
    %cst_26 = arith.constant dense<0.000000e+00> : vector<16x64xf32>
    %47 = tpu.matmul %45, %46, %cst_26 {dimension_numbers = #tpu.dot_dimension_numbers<[1], [0], [0], [1], [0, 0, 1, 1], [], []>} : vector<16x32xbf16>, vector<32x64xbf16>, vector<16x64xf32> -> vector<16x64xf32>
    %c0_27 = arith.constant 0 : index
    %c0_28 = arith.constant 0 : index
    %48 = vector.load %arg12[%c0_27, %c0_28] : memref<32x64xf32, #tpu.memory_space<vmem>>, vector<32x64xf32>
    %49 = arith.truncf %41 : vector<16x32xf32> to vector<16x32xbf16>
    %50 = arith.truncf %48 : vector<32x64xf32> to vector<32x64xbf16>
    %cst_29 = arith.constant dense<0.000000e+00> : vector<16x64xf32>
    %51 = tpu.matmul %49, %50, %cst_29 {dimension_numbers = #tpu.dot_dimension_numbers<[1], [0], [0], [1], [0, 0, 1, 1], [], []>} : vector<16x32xbf16>, vector<32x64xbf16>, vector<16x64xf32> -> vector<16x64xf32>
    %52 = arith.addf %47, %51 : vector<16x64xf32>
    %c0_30 = arith.constant 0 : index
    %c0_31 = arith.constant 0 : index
    %53 = vector.load %arg5[%c0_30, %c0_31] : memref<16x16xf32, #tpu.memory_space<vmem>>, vector<16x16xf32>
    %c0_32 = arith.constant 0 : index
    %c0_33 = arith.constant 0 : index
    %54 = vector.load %arg13[%c0_32, %c0_33] : memref<16x64xf32, #tpu.memory_space<vmem>>, vector<16x64xf32>
    %55 = arith.truncf %53 : vector<16x16xf32> to vector<16x16xbf16>
    %56 = arith.truncf %54 : vector<16x64xf32> to vector<16x64xbf16>
    %cst_34 = arith.constant dense<0.000000e+00> : vector<16x64xf32>
    %57 = tpu.matmul %55, %56, %cst_34 {dimension_numbers = #tpu.dot_dimension_numbers<[1], [0], [0], [1], [0, 0, 1, 1], [], []>} : vector<16x16xbf16>, vector<16x64xbf16>, vector<16x64xf32> -> vector<16x64xf32>
    %c0_35 = arith.constant 0 : index
    %c0_36 = arith.constant 0 : index
    %58 = vector.load %arg14[%c0_35, %c0_36] : memref<1x64xf32, #tpu.memory_space<vmem>>, vector<1x64xf32>
    %59 = vector.broadcast %58 : vector<1x64xf32> to vector<16x64xf32>
    %60 = arith.addf %57, %59 : vector<16x64xf32>
    %c0_37 = arith.constant 0 : index
    %c0_38 = arith.constant 0 : index
    %61 = vector.load %arg10[%c0_37, %c0_38] : memref<16x64xf32, #tpu.memory_space<vmem>>, vector<16x64xf32>
    %62 = arith.truncf %61 : vector<16x64xf32> to vector<16x64xbf16>
    %c0_39 = arith.constant 0 : index
    %c0_40 = arith.constant 0 : index
    %63 = vector.load %arg15[%c0_39, %c0_40] : memref<64x16xf32, #tpu.memory_space<vmem>>, vector<64x16xf32>
    %64 = arith.truncf %63 : vector<64x16xf32> to vector<64x16xbf16>
    %c0_41 = arith.constant 0 : index
    %c0_42 = arith.constant 0 : index
    %65 = vector.load %arg16[%c0_41, %c0_42] : memref<1x16xf32, #tpu.memory_space<vmem>>, vector<1x16xf32>
    %c0_43 = arith.constant 0 : index
    %c0_44 = arith.constant 0 : index
    %66 = vector.load %arg4[%c0_43, %c0_44] : memref<16x16xf32, #tpu.memory_space<vmem>>, vector<16x16xf32>
    %c0_i32 = arith.constant 0 : i32
    %67 = arith.index_cast %c0_i32 : i32 to index
    %c0_45 = arith.constant 0 : index
    %c0_46 = arith.constant 0 : index
    %68 = vector.load %arg1[%67, %c0_45, %c0_46] : memref<4x1x64xf32, #tpu.memory_space<vmem>>, vector<1x1x64xf32>
    %69 = vector.shape_cast %68 : vector<1x1x64xf32> to vector<1x64xf32>
    %70 = arith.truncf %66 : vector<16x16xf32> to vector<16x16xbf16>
    %cst_47 = arith.constant dense<0.000000e+00> : vector<16x64xf32>
    %71 = tpu.matmul %70, %62, %cst_47 {dimension_numbers = #tpu.dot_dimension_numbers<[1], [0], [0], [1], [0, 0, 1, 1], [], []>} : vector<16x16xbf16>, vector<16x64xbf16>, vector<16x64xf32> -> vector<16x64xf32>
    %72 = arith.addf %71, %60 : vector<16x64xf32>
    %73 = vector.broadcast %69 : vector<1x64xf32> to vector<16x64xf32>
    %74 = arith.addf %72, %73 : vector<16x64xf32>
    %75 = arith.mulf %74, %74 : vector<16x64xf32>
    %76 = arith.mulf %74, %75 : vector<16x64xf32>
    %cst_48 = arith.constant 4.471500e-02 : f32
    %77 = vector.broadcast %cst_48 : f32 to vector<16x64xf32>
    %78 = arith.mulf %77, %76 : vector<16x64xf32>
    %79 = arith.addf %74, %78 : vector<16x64xf32>
    %cst_49 = arith.constant 0.797884583 : f32
    %80 = vector.broadcast %cst_49 : f32 to vector<16x64xf32>
    %81 = arith.mulf %80, %79 : vector<16x64xf32>
    %82 = math.tanh %81 : vector<16x64xf32>
    %cst_50 = arith.constant 1.000000e+00 : f32
    %83 = vector.broadcast %cst_50 : f32 to vector<16x64xf32>
    %84 = arith.addf %83, %82 : vector<16x64xf32>
    %cst_51 = arith.constant 5.000000e-01 : f32
    %85 = vector.broadcast %cst_51 : f32 to vector<16x64xf32>
    %86 = arith.mulf %85, %84 : vector<16x64xf32>
    %87 = arith.mulf %74, %86 : vector<16x64xf32>
    %88 = arith.addf %74, %52 : vector<16x64xf32>
    %89 = arith.mulf %88, %88 : vector<16x64xf32>
    %90 = arith.mulf %88, %89 : vector<16x64xf32>
    %cst_52 = arith.constant 4.471500e-02 : f32
    %91 = vector.broadcast %cst_52 : f32 to vector<16x64xf32>
    %92 = arith.mulf %91, %90 : vector<16x64xf32>
    %93 = arith.addf %88, %92 : vector<16x64xf32>
    %cst_53 = arith.constant 0.797884583 : f32
    %94 = vector.broadcast %cst_53 : f32 to vector<16x64xf32>
    %95 = arith.mulf %94, %93 : vector<16x64xf32>
    %96 = math.tanh %95 : vector<16x64xf32>
    %cst_54 = arith.constant 1.000000e+00 : f32
    %97 = vector.broadcast %cst_54 : f32 to vector<16x64xf32>
    %98 = arith.addf %97, %96 : vector<16x64xf32>
    %cst_55 = arith.constant 5.000000e-01 : f32
    %99 = vector.broadcast %cst_55 : f32 to vector<16x64xf32>
    %100 = arith.mulf %99, %98 : vector<16x64xf32>
    %101 = arith.mulf %88, %100 : vector<16x64xf32>
    %102 = arith.subf %101, %87 : vector<16x64xf32>
    %cst_56 = arith.constant 2.000000e+00 : f32
    %103 = vector.broadcast %cst_56 : f32 to vector<16x64xf32>
    %104 = arith.mulf %103, %102 : vector<16x64xf32>
    %105 = arith.addf %87, %104 : vector<16x64xf32>
    %106 = arith.truncf %105 : vector<16x64xf32> to vector<16x64xbf16>
    %cst_57 = arith.constant dense<0.000000e+00> : vector<16x16xf32>
    %107 = tpu.matmul %106, %64, %cst_57 {dimension_numbers = #tpu.dot_dimension_numbers<[1], [0], [0], [1], [0, 0, 1, 1], [], []>} : vector<16x64xbf16>, vector<64x16xbf16>, vector<16x16xf32> -> vector<16x16xf32>
    %108 = vector.broadcast %65 : vector<1x16xf32> to vector<16x16xf32>
    %109 = arith.addf %107, %108 : vector<16x16xf32>
    %110 = arith.index_cast %c0_i32 : i32 to index
    %111 = memref.load %arg0[%110] : memref<4xf32, #tpu.memory_space<smem>>
    %112 = vector.broadcast %111 : f32 to vector<16x16xf32>
    %113 = arith.mulf %112, %109 : vector<16x16xf32>
    %114 = arith.addf %66, %113 : vector<16x16xf32>
    %c1_i32 = arith.constant 1 : i32
    %115 = arith.index_cast %c1_i32 : i32 to index
    %c0_58 = arith.constant 0 : index
    %c0_59 = arith.constant 0 : index
    %116 = vector.load %arg1[%115, %c0_58, %c0_59] : memref<4x1x64xf32, #tpu.memory_space<vmem>>, vector<1x1x64xf32>
    %117 = vector.shape_cast %116 : vector<1x1x64xf32> to vector<1x64xf32>
    %118 = arith.truncf %114 : vector<16x16xf32> to vector<16x16xbf16>
    %cst_60 = arith.constant dense<0.000000e+00> : vector<16x64xf32>
    %119 = tpu.matmul %118, %62, %cst_60 {dimension_numbers = #tpu.dot_dimension_numbers<[1], [0], [0], [1], [0, 0, 1, 1], [], []>} : vector<16x16xbf16>, vector<16x64xbf16>, vector<16x64xf32> -> vector<16x64xf32>
    %120 = arith.addf %119, %60 : vector<16x64xf32>
    %121 = vector.broadcast %117 : vector<1x64xf32> to vector<16x64xf32>
    %122 = arith.addf %120, %121 : vector<16x64xf32>
    %123 = arith.mulf %122, %122 : vector<16x64xf32>
    %124 = arith.mulf %122, %123 : vector<16x64xf32>
    %cst_61 = arith.constant 4.471500e-02 : f32
    %125 = vector.broadcast %cst_61 : f32 to vector<16x64xf32>
    %126 = arith.mulf %125, %124 : vector<16x64xf32>
    %127 = arith.addf %122, %126 : vector<16x64xf32>
    %cst_62 = arith.constant 0.797884583 : f32
    %128 = vector.broadcast %cst_62 : f32 to vector<16x64xf32>
    %129 = arith.mulf %128, %127 : vector<16x64xf32>
    %130 = math.tanh %129 : vector<16x64xf32>
    %cst_63 = arith.constant 1.000000e+00 : f32
    %131 = vector.broadcast %cst_63 : f32 to vector<16x64xf32>
    %132 = arith.addf %131, %130 : vector<16x64xf32>
    %cst_64 = arith.constant 5.000000e-01 : f32
    %133 = vector.broadcast %cst_64 : f32 to vector<16x64xf32>
    %134 = arith.mulf %133, %132 : vector<16x64xf32>
    %135 = arith.mulf %122, %134 : vector<16x64xf32>
    %136 = arith.addf %122, %52 : vector<16x64xf32>
    %137 = arith.mulf %136, %136 : vector<16x64xf32>
    %138 = arith.mulf %136, %137 : vector<16x64xf32>
    %cst_65 = arith.constant 4.471500e-02 : f32
    %139 = vector.broadcast %cst_65 : f32 to vector<16x64xf32>
    %140 = arith.mulf %139, %138 : vector<16x64xf32>
    %141 = arith.addf %136, %140 : vector<16x64xf32>
    %cst_66 = arith.constant 0.797884583 : f32
    %142 = vector.broadcast %cst_66 : f32 to vector<16x64xf32>
    %143 = arith.mulf %142, %141 : vector<16x64xf32>
    %144 = math.tanh %143 : vector<16x64xf32>
    %cst_67 = arith.constant 1.000000e+00 : f32
    %145 = vector.broadcast %cst_67 : f32 to vector<16x64xf32>
    %146 = arith.addf %145, %144 : vector<16x64xf32>
    %cst_68 = arith.constant 5.000000e-01 : f32
    %147 = vector.broadcast %cst_68 : f32 to vector<16x64xf32>
    %148 = arith.mulf %147, %146 : vector<16x64xf32>
    %149 = arith.mulf %136, %148 : vector<16x64xf32>
    %150 = arith.subf %149, %135 : vector<16x64xf32>
    %cst_69 = arith.constant 2.000000e+00 : f32
    %151 = vector.broadcast %cst_69 : f32 to vector<16x64xf32>
    %152 = arith.mulf %151, %150 : vector<16x64xf32>
    %153 = arith.addf %135, %152 : vector<16x64xf32>
    %154 = arith.truncf %153 : vector<16x64xf32> to vector<16x64xbf16>
    %cst_70 = arith.constant dense<0.000000e+00> : vector<16x16xf32>
    %155 = tpu.matmul %154, %64, %cst_70 {dimension_numbers = #tpu.dot_dimension_numbers<[1], [0], [0], [1], [0, 0, 1, 1], [], []>} : vector<16x64xbf16>, vector<64x16xbf16>, vector<16x16xf32> -> vector<16x16xf32>
    %156 = vector.broadcast %65 : vector<1x16xf32> to vector<16x16xf32>
    %157 = arith.addf %155, %156 : vector<16x16xf32>
    %158 = arith.index_cast %c1_i32 : i32 to index
    %159 = memref.load %arg0[%158] : memref<4xf32, #tpu.memory_space<smem>>
    %160 = vector.broadcast %159 : f32 to vector<16x16xf32>
    %161 = arith.mulf %160, %157 : vector<16x16xf32>
    %162 = arith.addf %114, %161 : vector<16x16xf32>
    %c2_i32 = arith.constant 2 : i32
    %163 = arith.index_cast %c2_i32 : i32 to index
    %c0_71 = arith.constant 0 : index
    %c0_72 = arith.constant 0 : index
    %164 = vector.load %arg1[%163, %c0_71, %c0_72] : memref<4x1x64xf32, #tpu.memory_space<vmem>>, vector<1x1x64xf32>
    %165 = vector.shape_cast %164 : vector<1x1x64xf32> to vector<1x64xf32>
    %166 = arith.truncf %162 : vector<16x16xf32> to vector<16x16xbf16>
    %cst_73 = arith.constant dense<0.000000e+00> : vector<16x64xf32>
    %167 = tpu.matmul %166, %62, %cst_73 {dimension_numbers = #tpu.dot_dimension_numbers<[1], [0], [0], [1], [0, 0, 1, 1], [], []>} : vector<16x16xbf16>, vector<16x64xbf16>, vector<16x64xf32> -> vector<16x64xf32>
    %168 = arith.addf %167, %60 : vector<16x64xf32>
    %169 = vector.broadcast %165 : vector<1x64xf32> to vector<16x64xf32>
    %170 = arith.addf %168, %169 : vector<16x64xf32>
    %171 = arith.mulf %170, %170 : vector<16x64xf32>
    %172 = arith.mulf %170, %171 : vector<16x64xf32>
    %cst_74 = arith.constant 4.471500e-02 : f32
    %173 = vector.broadcast %cst_74 : f32 to vector<16x64xf32>
    %174 = arith.mulf %173, %172 : vector<16x64xf32>
    %175 = arith.addf %170, %174 : vector<16x64xf32>
    %cst_75 = arith.constant 0.797884583 : f32
    %176 = vector.broadcast %cst_75 : f32 to vector<16x64xf32>
    %177 = arith.mulf %176, %175 : vector<16x64xf32>
    %178 = math.tanh %177 : vector<16x64xf32>
    %cst_76 = arith.constant 1.000000e+00 : f32
    %179 = vector.broadcast %cst_76 : f32 to vector<16x64xf32>
    %180 = arith.addf %179, %178 : vector<16x64xf32>
    %cst_77 = arith.constant 5.000000e-01 : f32
    %181 = vector.broadcast %cst_77 : f32 to vector<16x64xf32>
    %182 = arith.mulf %181, %180 : vector<16x64xf32>
    %183 = arith.mulf %170, %182 : vector<16x64xf32>
    %184 = arith.addf %170, %52 : vector<16x64xf32>
    %185 = arith.mulf %184, %184 : vector<16x64xf32>
    %186 = arith.mulf %184, %185 : vector<16x64xf32>
    %cst_78 = arith.constant 4.471500e-02 : f32
    %187 = vector.broadcast %cst_78 : f32 to vector<16x64xf32>
    %188 = arith.mulf %187, %186 : vector<16x64xf32>
    %189 = arith.addf %184, %188 : vector<16x64xf32>
    %cst_79 = arith.constant 0.797884583 : f32
    %190 = vector.broadcast %cst_79 : f32 to vector<16x64xf32>
    %191 = arith.mulf %190, %189 : vector<16x64xf32>
    %192 = math.tanh %191 : vector<16x64xf32>
    %cst_80 = arith.constant 1.000000e+00 : f32
    %193 = vector.broadcast %cst_80 : f32 to vector<16x64xf32>
    %194 = arith.addf %193, %192 : vector<16x64xf32>
    %cst_81 = arith.constant 5.000000e-01 : f32
    %195 = vector.broadcast %cst_81 : f32 to vector<16x64xf32>
    %196 = arith.mulf %195, %194 : vector<16x64xf32>
    %197 = arith.mulf %184, %196 : vector<16x64xf32>
    %198 = arith.subf %197, %183 : vector<16x64xf32>
    %cst_82 = arith.constant 2.000000e+00 : f32
    %199 = vector.broadcast %cst_82 : f32 to vector<16x64xf32>
    %200 = arith.mulf %199, %198 : vector<16x64xf32>
    %201 = arith.addf %183, %200 : vector<16x64xf32>
    %202 = arith.truncf %201 : vector<16x64xf32> to vector<16x64xbf16>
    %cst_83 = arith.constant dense<0.000000e+00> : vector<16x16xf32>
    %203 = tpu.matmul %202, %64, %cst_83 {dimension_numbers = #tpu.dot_dimension_numbers<[1], [0], [0], [1], [0, 0, 1, 1], [], []>} : vector<16x64xbf16>, vector<64x16xbf16>, vector<16x16xf32> -> vector<16x16xf32>
    %204 = vector.broadcast %65 : vector<1x16xf32> to vector<16x16xf32>
    %205 = arith.addf %203, %204 : vector<16x16xf32>
    %206 = arith.index_cast %c2_i32 : i32 to index
    %207 = memref.load %arg0[%206] : memref<4xf32, #tpu.memory_space<smem>>
    %208 = vector.broadcast %207 : f32 to vector<16x16xf32>
    %209 = arith.mulf %208, %205 : vector<16x16xf32>
    %210 = arith.addf %162, %209 : vector<16x16xf32>
    %c3_i32 = arith.constant 3 : i32
    %211 = arith.index_cast %c3_i32 : i32 to index
    %c0_84 = arith.constant 0 : index
    %c0_85 = arith.constant 0 : index
    %212 = vector.load %arg1[%211, %c0_84, %c0_85] : memref<4x1x64xf32, #tpu.memory_space<vmem>>, vector<1x1x64xf32>
    %213 = vector.shape_cast %212 : vector<1x1x64xf32> to vector<1x64xf32>
    %214 = arith.truncf %210 : vector<16x16xf32> to vector<16x16xbf16>
    %cst_86 = arith.constant dense<0.000000e+00> : vector<16x64xf32>
    %215 = tpu.matmul %214, %62, %cst_86 {dimension_numbers = #tpu.dot_dimension_numbers<[1], [0], [0], [1], [0, 0, 1, 1], [], []>} : vector<16x16xbf16>, vector<16x64xbf16>, vector<16x64xf32> -> vector<16x64xf32>
    %216 = arith.addf %215, %60 : vector<16x64xf32>
    %217 = vector.broadcast %213 : vector<1x64xf32> to vector<16x64xf32>
    %218 = arith.addf %216, %217 : vector<16x64xf32>
    %219 = arith.mulf %218, %218 : vector<16x64xf32>
    %220 = arith.mulf %218, %219 : vector<16x64xf32>
    %cst_87 = arith.constant 4.471500e-02 : f32
    %221 = vector.broadcast %cst_87 : f32 to vector<16x64xf32>
    %222 = arith.mulf %221, %220 : vector<16x64xf32>
    %223 = arith.addf %218, %222 : vector<16x64xf32>
    %cst_88 = arith.constant 0.797884583 : f32
    %224 = vector.broadcast %cst_88 : f32 to vector<16x64xf32>
    %225 = arith.mulf %224, %223 : vector<16x64xf32>
    %226 = math.tanh %225 : vector<16x64xf32>
    %cst_89 = arith.constant 1.000000e+00 : f32
    %227 = vector.broadcast %cst_89 : f32 to vector<16x64xf32>
    %228 = arith.addf %227, %226 : vector<16x64xf32>
    %cst_90 = arith.constant 5.000000e-01 : f32
    %229 = vector.broadcast %cst_90 : f32 to vector<16x64xf32>
    %230 = arith.mulf %229, %228 : vector<16x64xf32>
    %231 = arith.mulf %218, %230 : vector<16x64xf32>
    %232 = arith.addf %218, %52 : vector<16x64xf32>
    %233 = arith.mulf %232, %232 : vector<16x64xf32>
    %234 = arith.mulf %232, %233 : vector<16x64xf32>
    %cst_91 = arith.constant 4.471500e-02 : f32
    %235 = vector.broadcast %cst_91 : f32 to vector<16x64xf32>
    %236 = arith.mulf %235, %234 : vector<16x64xf32>
    %237 = arith.addf %232, %236 : vector<16x64xf32>
    %cst_92 = arith.constant 0.797884583 : f32
    %238 = vector.broadcast %cst_92 : f32 to vector<16x64xf32>
    %239 = arith.mulf %238, %237 : vector<16x64xf32>
    %240 = math.tanh %239 : vector<16x64xf32>
    %cst_93 = arith.constant 1.000000e+00 : f32
    %241 = vector.broadcast %cst_93 : f32 to vector<16x64xf32>
    %242 = arith.addf %241, %240 : vector<16x64xf32>
    %cst_94 = arith.constant 5.000000e-01 : f32
    %243 = vector.broadcast %cst_94 : f32 to vector<16x64xf32>
    %244 = arith.mulf %243, %242 : vector<16x64xf32>
    %245 = arith.mulf %232, %244 : vector<16x64xf32>
    %246 = arith.subf %245, %231 : vector<16x64xf32>
    %cst_95 = arith.constant 2.000000e+00 : f32
    %247 = vector.broadcast %cst_95 : f32 to vector<16x64xf32>
    %248 = arith.mulf %247, %246 : vector<16x64xf32>
    %249 = arith.addf %231, %248 : vector<16x64xf32>
    %250 = arith.truncf %249 : vector<16x64xf32> to vector<16x64xbf16>
    %cst_96 = arith.constant dense<0.000000e+00> : vector<16x16xf32>
    %251 = tpu.matmul %250, %64, %cst_96 {dimension_numbers = #tpu.dot_dimension_numbers<[1], [0], [0], [1], [0, 0, 1, 1], [], []>} : vector<16x64xbf16>, vector<64x16xbf16>, vector<16x16xf32> -> vector<16x16xf32>
    %252 = vector.broadcast %65 : vector<1x16xf32> to vector<16x16xf32>
    %253 = arith.addf %251, %252 : vector<16x16xf32>
    %254 = arith.index_cast %c3_i32 : i32 to index
    %255 = memref.load %arg0[%254] : memref<4xf32, #tpu.memory_space<smem>>
    %256 = vector.broadcast %255 : f32 to vector<16x16xf32>
    %257 = arith.mulf %256, %253 : vector<16x16xf32>
    %258 = arith.addf %210, %257 : vector<16x16xf32>
    %c4_i32 = arith.constant 4 : i32
    %c0_97 = arith.constant 0 : index
    %c0_98 = arith.constant 0 : index
    %259 = vector.load %arg17[%c0_97, %c0_98] : memref<16x16xf32, #tpu.memory_space<vmem>>, vector<16x16xf32>
    tpu.vector_store %arg17[%c0_97, %c0_98], %258 {strides = array<i32>} : memref<16x16xf32, #tpu.memory_space<vmem>>, vector<16x16xf32>,
    return
  }
}

</mosaic_0001>

<bundles_post_ra>
// kernel: gesture_lsm_forward.1
= control target key start
LH: loop header
LB: loop body
LE: loop exit
PB: predicated region body
PF: predicated region fallthrough
CT: control target
= control target key end

     0   :  { %s1843_s0 = inlined_call_operand.vmem [shape: f32[4], index: 0, kind: input, shape index: {}]   ;;  %s1844_s1 = inlined_call_operand.vmem [shape: f32[4,1,64], index: 1, kind: input, shape index: {}]   ;;  %s1845_s2 = inlined_call_operand.vmem [shape: f32[16,24], index: 2, kind: input, shape index: {}]   ;;  %s1846_s3 = inlined_call_operand.vmem [shape: f32[16,24], index: 3, kind: input, shape index: {}]   ;;  %s1847_s4 = inlined_call_operand.vmem [shape: f32[16,16], index: 4, kind: input, shape index: {}]   ;;  %s1848_s5 = inlined_call_operand.vmem [shape: f32[16,16], index: 5, kind: input, shape index: {}]   ;;  %s1849_s6 = inlined_call_operand.vmem [shape: f32[24,32], index: 6, kind: input, shape index: {}]   ;;  %s1850_s7 = inlined_call_operand.vmem [shape: f32[1,32], index: 7, kind: input, shape index: {}]   ;;  %s1851_s8 = inlined_call_operand.vmem [shape: f32[24,32], index: 8, kind: input, shape index: {}]   ;;  %s1852_s9 = inlined_call_operand.vmem [shape: f32[1,32], index: 9, kind: input, shape index: {}]   ;;  %s1853_s10 = inlined_call_operand.vmem [shape: f32[16,64], index: 10, kind: input, shape index: {}]   ;;  %s1854_s11 = inlined_call_operand.vmem [shape: f32[32,64], index: 11, kind: input, shape index: {}]   ;;  %s1855_s12 = inlined_call_operand.vmem [shape: f32[32,64], index: 12, kind: input, shape index: {}]   ;;  %s1856_s13 = inlined_call_operand.vmem [shape: f32[16,64], index: 13, kind: input, shape index: {}]   ;;  %s1857_s14 = inlined_call_operand.vmem [shape: f32[1,64], index: 14, kind: input, shape index: {}]   ;;  %s1858_s15 = inlined_call_operand.vmem [shape: f32[64,16], index: 15, kind: input, shape index: {}]   ;;  %s1859_s16 = inlined_call_operand.vmem [shape: f32[1,16], index: 16, kind: input, shape index: {}]   ;;  %s1860_s17 = inlined_call_operand.hbm [shape: f32[16,16], index: 17, kind: output, shape index: {0}]   ;;  %s1861_s18 = inlined_call_operand.hbm [shape: f32[16,32], index: 18, kind: output, shape index: {1}]   ;;  %s1862_s19 = inlined_call_operand.hbm [shape: f32[16,32], index: 19, kind: output, shape index: {2}]  }
   0x1   :  { %1866 = sst [smem:[#allocation12_spill]] %s1843_s0 }
   0x2   :  { %1867 = sst [smem:[#allocation13_spill]] %s1844_s1 }
   0x3   :  { %1868 = sst [smem:[#allocation14_spill]] %s1845_s2 }
   0x4   :  { %1869 = sst [smem:[#allocation15_spill]] %s1846_s3 }
   0x5   :  { %25 = vsyncpa [#allocation4], 0 }
   0x6   :  { %26 = vsyncpa [#allocation3], 0 }
   0x7   :  { %27 = vsyncpa [#allocation7], 0  ;;  %s1870_s20 = sld [smem:[#allocation12_spill]] }
   0xd   :  { %s34_s21 = sshll.u32 %s1870_s20, 4  ;;  %s35_s21 = int_to_ptr.vmem [resolvable:$true] %s34_s21 }
   0xe   :  { %s1307_s1 = scalar_lea.vmem %s35_s21, 16  ;;  %p1312_p1 = scmp.lt.s32.totalorder %s35_s21, %s35_s21 }
   0xf   :  { %p1308_p0 = scmp.ne.s32.totalorder %s35_s21, %s1307_s1  ;;  %p1313_p2 = scmp.lt.s32.totalorder %s1307_s1, %s1307_s1 }
  0x11   :  { %p1314_p3 = por %p1313_p2, %p1312_p1 }
  0x13   :  { %p1315_p4 = pnand %p1314_p3, %p1308_p0 }
  0x15   :  { %1318 = shalt.err (!%p1315_p4)
}
  0x16   :  { %s1391_s22 = smov [#allocation2]  }
  0x17   :  { %37 = dma.vmem_to_smem %s35_s21, 16, %s1391_s22, [#allocation4]  }
  0x18   :  { %1385 = dma.done.wait [#allocation4], 16  }
  0x19   :  { %1386 = vsyncadd [#allocation4], 4294967280 }
  0x1a   :  { %73 = sfence }
  0x1b   :  { %v77_v0 = vld [vmem:[%s1849_s6] sm:$0xff]  ;;  %v78_v1 = vld [vmem:[%s1849_s6 + $0x8] sm:$0xff]  ;;  %v1392_v3 = vmov 0.0   ;;  %v79_v6 = vld [vmem:[%s1849_s6 + $0x10] sm:$0xff]  ;;  %vm94_vm0 = vcmask 1043456   ;;  %vm1393_vm1 = vmmov 0  }
  0x1c   :  { %v159_v2 = vld [vmem:[%s1851_s8] sm:$0xff]  ;;  %1145 = vmatprep.subr.bf16.mxu0 %v1392_v3  ;;  %1153 = vmatprep.subr.bf16.mxu1 %v1392_v3  ;;  %v81_v4 = vpack.c.bf16 %v78_v1, %v77_v0  ;;  %v160_v5 = vld [vmem:[%s1851_s8 + $0x8] sm:$0xff]  ;;  %v161_v7 = vld [vmem:[%s1851_s8 + $0x10] sm:$0xff]  ;;  %v82_v9 = vpack.c.bf16 %v79_v6, %v79_v6  ;;  %s1871_s22 = sld [smem:[#allocation14_spill]]  ;;  %s1872_s24 = sld [smem:[#allocation15_spill]]  ;;  %vm90_vm2 = vcmask 195584  }
  0x1d   :  { %v163_v8 = vpack.c.bf16 %v160_v5, %v159_v2  ;;  %v164_v10 = vpack.c.bf16 %v161_v7, %v161_v7  ;;  %1149 = vmatprep.mubr.msk.bf16.mxu0 %vm1393_vm1, %v1392_v3  ;;  %1157 = vmatprep.mubr.msk.bf16.mxu1 %vm1393_vm1, %v1392_v3  ;;  %v346_v17 = vld [vmem:[%s1856_s13] sm:$0xff]  ;;  %v347_v18 = vld [vmem:[%s1856_s13 + $0x8] sm:$0xff]  ;;  %vm357_vm3 = vcmask 130048   ;;  %v251_v34 = vld [vmem:[%s1855_s12 + $0x10] sm:$0xff]  ;;  %vm237_vm4 = vcmask 261120   ;;  %s1394_s23 = smov [#allocation6]  }
  0x1e   :  { %1146 = vmatpush3.bf16.msra.mxu0 %v81_v4  ;;  %v96_v13 = vsel %vm94_vm0, %v82_v9, 0  ;;  %v349_v21 = vpack.c.bf16 %v347_v18, %v346_v17  ;;  %v344_v22 = vld [vmem:[%s1848_s5] sm:$0xff]  ;;  %v345_v23 = vld [vmem:[%s1848_s5 + $0x8] sm:$0xff]  ;;  %v252_v35 = vld [vmem:[%s1855_s12 + $0x18] sm:$0xff]  ;;  %vm525_vm5 = vcmask 523264   ;;  %s1097_s5 = sld [smem:[#allocation2 + $0x2]] }
  0x1f   :  { %1154 = vmatpush3.bf16.msra.mxu1 %v163_v8  ;;  %1147 = vmatprep.subr.bf16.mxu0 %v1392_v3  ;;  %v176_v16 = vsel %vm94_vm0, %v164_v10, 0  ;;  %v348_v24 = vpack.c.bf16 %v345_v23, %v344_v22  ;;  %v402_v25 = vld [vmem:[%s1853_s10] sm:$0xff]  ;;  %v403_v26 = vld [vmem:[%s1853_s10 + $0x8] sm:$0xff]  ;;  %v255_v36 = vpack.c.bf16 %v252_v35, %v251_v34  ;;  %s1045_s10 = sshll.u32 %s1394_s23, 4  ;;  %s1046_s10 = int_to_ptr.vmem [resolvable:$true] %s1045_s10 }
  0x20   :  { %1155 = vmatprep.subr.bf16.mxu1 %v1392_v3  ;;  %v1570_v27 = vpack.c.bf16 %v403_v26, %v402_v25  ;;  %v1576_v28 = vld [vmem:[%s1847_s4] sm:$0xff]  ;;  %v1581_v29 = vld [vmem:[%s1847_s4 + $0x8] sm:$0xff]  ;;  %p1324_p6 = scmp.lt.s32.totalorder %s1046_s10, %s1046_s10 }
  0x21   :  { %v421_v30 = vpack.c.bf16 %v1581_v29, %v1576_v28  ;;  %v249_v31 = vld [vmem:[%s1855_s12] sm:$0xff]  ;;  %v250_v32 = vld [vmem:[%s1855_s12 + $0x8] sm:$0xff]  ;;  %s1873_s12 = sld [smem:[#allocation13_spill]] }
  0x22   :  { %v75_v11 = vld [vmem:[%s1871_s22] sm:$0xff]  ;;  %v76_v12 = vld [vmem:[%s1871_s22 + $0x8] sm:$0xff]  ;;  %1148 = vmatpush3.bf16.msra.mxu0 %v96_v13  ;;  %v254_v33 = vpack.c.bf16 %v250_v32, %v249_v31  ;;  %v244_v32 = vld [vmem:[%s1854_s11 + $0x10] sm:$0xff]  ;;  %s1092_s22 = sld [smem:[#allocation2 + $0x1]] }
  0x23   :  { %v157_v14 = vld [vmem:[%s1872_s24] sm:$0xff]  ;;  %v158_v15 = vld [vmem:[%s1872_s24 + $0x8] sm:$0xff]  ;;  %v80_v19 = vpack.c.bf16 %v76_v12, %v75_v11  ;;  %1156 = vmatpush3.bf16.msra.mxu1 %v176_v16  ;;  %1161 = vmatprep.subr.bf16.mxu0 %v1392_v3  ;;  %s1319_s24 = scalar_lea.vmem %s1046_s10, 256 }
  0x24   :  { %v162_v20 = vpack.c.bf16 %v158_v15, %v157_v14  ;;  %1177 = vmatprep.subr.bf16.mxu1 %v1392_v3  ;;  %v1076_v37 = vld [vmem:[%s1850_s7] ss:$0 sm:$0xff]  ;;  %v243_v23 = vld [vmem:[%s1854_s11 + $0x8] sm:$0xff]  ;;  %p1320_p5 = scmp.ne.s32.totalorder %s1046_s10, %s1319_s24  ;;  %p1325_p7 = scmp.lt.s32.totalorder %s1319_s24, %s1319_s24 }
  0x25   :  { %1150 = vmatmul.mubr.msk.bf16.vlgmr.msra.gmra.mrb[0].mxu0 %vm90_vm2, %v80_v19  ;;  %v1078_v38 = vld [vmem:[%s1852_s9] ss:$0 sm:$0xff] }
  0x26   :  { %1158 = vmatmul.mubr.msk.bf16.vlgmr.msra.gmra.mrb[0].mxu1 %vm90_vm2, %v162_v20  ;;  %1165 = vmatprep.mubr.msk.bf16.mxu0 %vm1393_vm1, %v1392_v3  ;;  %v242_v22 = vld [vmem:[%s1854_s11] sm:$0xff]  ;;  %p1326_p8 = por %p1325_p7, %p1324_p6 }
  0x27   :  { %1178 = vmatpush3.bf16.msra.mxu1 %v349_v21  ;;  %1179 = vmatprep.mubr.msk.bf16.mxu1 %vm1393_vm1, %v1392_v3 }
  0x28   :  { %1183 = vmatprep.subr.bf16.mxu1 %v1392_v3  ;;  %1162 = vmatpush3.bf16.msra.mxu0 %v254_v33  ;;  %v245_v33 = vld [vmem:[%s1854_s11 + $0x18] sm:$0xff]  ;;  %p1327_p9 = pnand %p1326_p8, %p1320_p5 }
  0x29   :  { %1163 = vmatprep.subr.bf16.mxu0 %v1392_v3  ;;  %v248_v34 = vpack.c.bf16 %v245_v33, %v244_v32 }
  0x2c   :  { %1164 = vmatpush3.bf16.msra.mxu0 %v255_v36 }
  0x2d   :  { %1169 = vmatprep.subr.bf16.mxu0 %v1392_v3 }
  0x2e   :  { %1180 = vmatmul.mubr.msk.bf16.vlgmr.msra.gmra.mrb[4].mxu1 %vm357_vm3, %v348_v24 }
  0x2f   :  { %1185 = vmatprep.mubr.msk.bf16.mxu1 %vm1393_vm1, %v1392_v3  ;;  %1184 = vmatpush3.bf16.msra.mxu1 %v1570_v27 }
  0x30   :  { %1201 = vmatprep.subr.bf16.mxu1 %v1392_v3 }
  0x36   :  { %1186 = vmatmul.mubr.msk.bf16.vlgmr.msra.gmra.mrb[8].mxu1 %vm357_vm3, %v421_v30  ;;  %v247_v30 = vpack.c.bf16 %v243_v23, %v242_v22 }
  0x37   :  { %1202 = vmatpush3.bf16.msra.mxu1 %v1570_v27  ;;  %1203 = vmatprep.mubr.msk.bf16.mxu1 %vm1393_vm1, %v1392_v3 }
  0x38   :  { %1207 = vmatprep.subr.bf16.mxu1 %v1392_v3 }
  0xf8   :  { %v132_v39 = vpop.f32.mrb[0].mxu0 }
  0xf9   :  { %v133_v40 = vadd.f32 %v1076_v37, %v132_v39  ;;  %v212_v41 = vpop.f32.mrb[0].mxu1  ;;  %v1151_v42 = vpop.f32.mrb[1].mxu0 }
  0xfa   :  { %v213_v43 = vadd.f32 %v1078_v38, %v212_v41  ;;  %v1159_v44 = vpop.f32.mrb[1].mxu1  ;;  %v135_v45 = vpop.f32.mrb[2].mxu0 }
  0xfb   :  { %v139_v46 = vmul.f32 %v133_v40, %v133_v40  ;;  %v136_v47 = vadd.f32 %v1076_v37, %v135_v45  ;;  %v215_v48 = vpop.f32.mrb[2].mxu1  ;;  %v1152_v49 = vpop.f32.mrb[3].mxu0  ;;  %v406_v44 = vld [vmem:[%s1858_s15 + $0x8] sm:$0xff] }
  0xfc   :  { %v219_v50 = vmul.f32 %v213_v43, %v213_v43  ;;  %v216_v51 = vadd.f32 %v1078_v38, %v215_v48  ;;  %v1160_v52 = vpop.f32.mrb[3].mxu1  ;;  %v409_v49 = vld [vmem:[%s1858_s15 + $0x20] sm:$0xff] }
  0xfd   :  { %v141_v53 = vmul.f32 %v139_v46, %v133_v40  ;;  %v140_v54 = vmul.f32 %v136_v47, %v136_v47  ;;  %v407_v46 = vld [vmem:[%s1858_s15 + $0x10] sm:$0xff] }
  0xfe   :  { %v221_v55 = vmul.f32 %v219_v50, %v213_v43  ;;  %v220_v56 = vmul.f32 %v216_v51, %v216_v51  ;;  %v410_v50 = vld [vmem:[%s1858_s15 + $0x28] sm:$0xff]  ;;  %v411_v52 = vld [vmem:[%s1858_s15 + $0x30] sm:$0xff] }
  0xff   :  { %v143_v57 = vmul.f32 0.044715, %v141_v53  ;;  %v142_v58 = vmul.f32 %v140_v54, %v136_v47  ;;  %v412_v53 = vld [vmem:[%s1858_s15 + $0x38] sm:$0xff] }
 0x100   :  { %v223_v59 = vmul.f32 0.044715, %v221_v55  ;;  %v222_v60 = vmul.f32 %v220_v56, %v216_v51  ;;  %v1670_v54 = vpack.c.bf16 %v412_v53, %v411_v52  ;;  %v1082_v55 = vld [vmem:[%s1857_s14] ss:$0 sm:$0xff]  ;;  %s570_s14 = sld [smem:[#allocation2]] }
 0x101   :  { %v145_v61 = vadd.f32 %v143_v57, %v133_v40  ;;  %v144_v62 = vmul.f32 0.044715, %v142_v58  ;;  %v395_v35 = vpop.f32.mrb[4].mxu1 }
 0x102   :  { %v225_v63 = vadd.f32 %v223_v59, %v213_v43  ;;  %v224_v0 = vmul.f32 0.044715, %v222_v60  ;;  %v1181_v36 = vpop.f32.mrb[5].mxu1  ;;  %v1678_v56 = vadd.f32 %v1082_v55, %v395_v35  ;;  %v1085_v59 = vld [vmem:[%s1873_s12] ss:$0 sm:$0xff] }
 0x103   :  { %v147_v1 = vmul.f32 0.7978846, %v145_v61  ;;  %v146_v2 = vadd.f32 %v144_v62, %v136_v47  ;;  %v398_v37 = vpop.f32.mrb[6].mxu1 }
 0x104   :  { %v227_v4 = vmul.f32 0.7978846, %v225_v63  ;;  %v226_v5 = vadd.f32 %v224_v0, %v216_v51  ;;  %v1182_v38 = vpop.f32.mrb[7].mxu1  ;;  %v1680_v57 = vadd.f32 %v1082_v55, %v398_v37 }
 0x105   :  { %1267 = vtanh.f32 %v147_v1  ;;  %v148_v6 = vmul.f32 0.7978846, %v146_v2 }
 0x106   :  { %1269 = vtanh.f32 %v227_v4  ;;  %v228_v7 = vmul.f32 0.7978846, %v226_v5 }
 0x107   :  { %1271 = vtanh.f32 %v148_v6 }
 0x108   :  { %1273 = vtanh.f32 %v228_v7 }
 0x109   :  { %v459_v39 = vpop.f32.mrb[8].mxu1 }
 0x10a   :  { %v460_v58 = vadd.f32 %v459_v39, %v1678_v56 }
 0x10c   :  { %v472_v61 = vadd.f32 %v1085_v59, %v460_v58  ;;  %v1701_v58 = vld [vmem:[%s1859_s16] ss:$0 sm:$0xff] }
 0x10e   :  { %v474_v63 = vmul.f32 %v472_v61, %v472_v61 }
 0x10f   :  { %v1268_v8 = vpop.eup %1267 }
 0x110   :  { %v1270_v9 = vpop.eup %1269  ;;  %v151_v10 = vadd.f32 1.0, %v1268_v8  ;;  %v476_v1 = vmul.f32 %v474_v63, %v472_v61 }
 0x111   :  { %v1272_v11 = vpop.eup %1271  ;;  %v231_v12 = vadd.f32 1.0, %v1270_v9 }
 0x112   :  { %v1274_v13 = vpop.eup %1273  ;;  %v153_v14 = vmul.f32 0.5, %v151_v10  ;;  %v152_v15 = vadd.f32 1.0, %v1272_v11  ;;  %v478_v4 = vmul.f32 0.044715, %v476_v1 }
 0x113   :  { %v233_v16 = vmul.f32 0.5, %v231_v12  ;;  %v232_v17 = vadd.f32 1.0, %v1274_v13 }
 0x114   :  { %v155_v18 = vmul.f32 %v153_v14, %v133_v40  ;;  %v154_v19 = vmul.f32 0.5, %v152_v15  ;;  %v1187_v40 = vpop.f32.mrb[9].mxu1  ;;  %v480_v6 = vadd.f32 %v478_v4, %v472_v61 }
 0x115   :  { %v235_v20 = vmul.f32 %v233_v16, %v213_v43  ;;  %v234_v21 = vmul.f32 0.5, %v232_v17  ;;  %v462_v41 = vpop.f32.mrb[10].mxu1  ;;  %v405_v43 = vld [vmem:[%s1858_s15] sm:$0xff] }
 0x116   :  { %v156_v24 = vmul.f32 %v154_v19, %v136_v47  ;;  %238 = vst.msk [vmem:[#allocation6] sm:$0xff] %vm237_vm4, %v155_v18  ;;  %v1188_v42 = vpop.f32.mrb[11].mxu1  ;;  %v1641_v45 = vpack.c.bf16 %v406_v44, %v405_v43  ;;  %v408_v47 = vld [vmem:[%s1858_s15 + $0x18] sm:$0xff]  ;;  %v463_v60 = vadd.f32 %v462_v41, %v1680_v57  ;;  %v482_v12 = vmul.f32 0.7978846, %v480_v6 }
 0x117   :  { %v236_v25 = vmul.f32 %v234_v21, %v216_v51  ;;  %240 = vst.msk [vmem:[#allocation8] sm:$0xff] %vm237_vm4, %v235_v20  ;;  %v1651_v48 = vpack.c.bf16 %v408_v47, %v407_v46  ;;  %v1661_v51 = vpack.c.bf16 %v410_v50, %v409_v49 }
 0x118   :  { %v246_v26 = vpack.c.bf16 %v156_v24, %v155_v18  ;;  %239 = vst.msk [vmem:[#allocation6 + $0x8] sm:$0xff] %vm237_vm4, %v156_v24  ;;  %v473_v62 = vadd.f32 %v1085_v59, %v463_v60  ;;  %1275 = vtanh.f32 %v482_v12  ;;  %v571_v60 = vstv %s570_s14 }
 0x119   :  { %v253_v31 = vpack.c.bf16 %v236_v25, %v235_v20  ;;  %241 = vst.msk [vmem:[#allocation8 + $0x8] sm:$0xff] %vm237_vm4, %v236_v25 }
 0x11a   :  { %v475_v0 = vmul.f32 %v473_v62, %v473_v62 }
 0x11b   :  { %1166 = vmatmul.mubr.msk.bf16.vlgmr.msra.gmra.mrb[4].mxu0 %vm237_vm4, %v253_v31 }
 0x11c   :  { %1170 = vmatpush3.bf16.msra.mxu0 %v247_v30  ;;  %1173 = vmatprep.mubr.msk.bf16.mxu0 %vm1393_vm1, %v1392_v3  ;;  %v477_v2 = vmul.f32 %v475_v0, %v473_v62 }
 0x11d   :  { %1171 = vmatprep.subr.bf16.mxu0 %v1392_v3 }
 0x11e   :  { %v479_v5 = vmul.f32 0.044715, %v477_v2 }
 0x120   :  { %1172 = vmatpush3.bf16.msra.mxu0 %v248_v34  ;;  %v481_v8 = vadd.f32 %v479_v5, %v473_v62 }
 0x121   :  { %1189 = vmatprep.subr.bf16.mxu0 %v1392_v3 }
 0x122   :  { %v483_v16 = vmul.f32 0.7978846, %v481_v8 }
 0x124   :  { %1277 = vtanh.f32 %v483_v16 }
 0x127   :  { %1174 = vmatmul.mubr.msk.bf16.vlgmr.msra.gmra.mrb[4].mxu0 %vm237_vm4, %v246_v26  ;;  %v1276_v26 = vpop.eup %1275 }
 0x128   :  { %1197 = vmatprep.mubr.msk.bf16.mxu0 %vm1393_vm1, %v1392_v3  ;;  %1190 = vmatpush3.bf16.msra.mxu0 %v1641_v45  ;;  %v486_v31 = vadd.f32 1.0, %v1276_v26 }
 0x129   :  { %1191 = vmatprep.subr.bf16.mxu0 %v1392_v3 }
 0x12a   :  { %v488_v34 = vmul.f32 0.5, %v486_v31 }
 0x12c   :  { %1192 = vmatpush3.bf16.msra.mxu0 %v1651_v48  ;;  %v490_v40 = vmul.f32 %v488_v34, %v472_v61 }
 0x12d   :  { %1193 = vmatprep.subr.bf16.mxu0 %v1392_v3 }
 0x12e   :  { %v1278_v30 = vpop.eup %1277 }
 0x12f   :  { %v487_v32 = vadd.f32 1.0, %v1278_v30 }
 0x130   :  { %1194 = vmatpush3.bf16.msra.mxu0 %v1661_v51 }
 0x131   :  { %1195 = vmatprep.subr.bf16.mxu0 %v1392_v3  ;;  %v489_v37 = vmul.f32 0.5, %v487_v32 }
 0x133   :  { %v491_v43 = vmul.f32 %v489_v37, %v473_v62 }
 0x134   :  { %1196 = vmatpush3.bf16.msra.mxu0 %v1670_v54 }
 0x135   :  { %1219 = vmatprep.subr.bf16.mxu0 %v1392_v3 }
 0x1fa   :  { %v1687_v7 = vpop.f32.mrb[4].mxu0 }
 0x1fb   :  { %v492_v9 = vadd.f32 %v472_v61, %v1687_v7  ;;  %v1175_v10 = vpop.f32.mrb[5].mxu0 }
 0x1fc   :  { %v1690_v11 = vpop.f32.mrb[6].mxu0 }
 0x1fd   :  { %v494_v13 = vmul.f32 %v492_v9, %v492_v9  ;;  %v493_v14 = vadd.f32 %v473_v62, %v1690_v11  ;;  %v1176_v15 = vpop.f32.mrb[7].mxu0 }
 0x1ff   :  { %v496_v17 = vmul.f32 %v494_v13, %v492_v9  ;;  %v495_v18 = vmul.f32 %v493_v14, %v493_v14 }
 0x201   :  { %v498_v19 = vmul.f32 0.044715, %v496_v17  ;;  %v497_v20 = vmul.f32 %v495_v18, %v493_v14 }
 0x203   :  { %v500_v21 = vadd.f32 %v498_v19, %v492_v9  ;;  %v499_v22 = vmul.f32 0.044715, %v497_v20 }
 0x205   :  { %v502_v23 = vmul.f32 0.7978846, %v500_v21  ;;  %v501_v24 = vadd.f32 %v499_v22, %v493_v14 }
 0x207   :  { %1279 = vtanh.f32 %v502_v23  ;;  %v503_v25 = vmul.f32 0.7978846, %v501_v24 }
 0x209   :  { %1281 = vtanh.f32 %v503_v25 }
 0x211   :  { %v1280_v33 = vpop.eup %1279 }
 0x212   :  { %v506_v35 = vadd.f32 1.0, %v1280_v33 }
 0x213   :  { %v1282_v36 = vpop.eup %1281 }
 0x214   :  { %v508_v38 = vmul.f32 0.5, %v506_v35  ;;  %v507_v39 = vadd.f32 1.0, %v1282_v36 }
 0x216   :  { %v510_v41 = vmul.f32 %v508_v38, %v492_v9  ;;  %v509_v42 = vmul.f32 0.5, %v507_v39 }
 0x218   :  { %v512_v44 = vsub.f32 %v510_v41, %v490_v40  ;;  %v511_v46 = vmul.f32 %v509_v42, %v493_v14 }
 0x21a   :  { %v513_v47 = vsub.f32 %v511_v46, %v491_v43  ;;  %v514_v49 = vmul.f32 2.0, %v512_v44 }
 0x21c   :  { %v515_v50 = vmul.f32 2.0, %v513_v47  ;;  %v516_v52 = vadd.f32 %v514_v49, %v490_v40 }
 0x21e   :  { %v517_v53 = vadd.f32 %v515_v50, %v491_v43 }
 0x220   :  { %v518_v55 = vpack.c.bf16 %v517_v53, %v516_v52 }
 0x222   :  { %1198 = vmatmul.mubr.msk.bf16.vlgmr.msra.gmra.mrb[8].mxu0 %vm525_vm5, %v518_v55 }
 0x223   :  { %1220 = vmatpush3.bf16.msra.mxu0 %v1570_v27  ;;  %1221 = vmatprep.mubr.msk.bf16.mxu0 %vm1393_vm1, %v1392_v3 }
 0x224   :  { %1225 = vmatprep.subr.bf16.mxu0 %v1392_v3 }
 0x2f5   :  { %v563_v59 = vpop.f32.mrb[8].mxu0 }
 0x2f6   :  { %v564_v61 = vadd.f32 %v1701_v58, %v563_v59  ;;  %v1199_v62 = vpop.f32.mrb[9].mxu0 }
 0x2f7   :  { %v566_v63 = vpop.f32.mrb[10].mxu0 }
 0x2f8   :  { %v572_v0 = vmul.f32 %v571_v60, %v564_v61  ;;  %v567_v1 = vadd.f32 %v1701_v58, %v566_v63  ;;  %v1200_v2 = vpop.f32.mrb[11].mxu0 }
 0x2fa   :  { %v573_v4 = vmul.f32 %v571_v60, %v567_v1  ;;  %v1706_v5 = vadd.f32 %v572_v0, %v1576_v28  ;;  %v1090_v28 = vld [vmem:[%s1873_s12 + $0x1] ss:$0 sm:$0xff] }
 0x2fc   :  { %v1709_v6 = vadd.f32 %v573_v4, %v1581_v29 }
 0x2fe   :  { %v578_v8 = vpack.c.bf16 %v1709_v6, %v1706_v5 }
 0x300   :  { %1204 = vmatmul.mubr.msk.bf16.vlgmr.msra.gmra.mrb[12].mxu1 %vm357_vm3, %v578_v8 }
 0x301   :  { %1208 = vmatpush3.bf16.msra.mxu1 %v1641_v45  ;;  %1215 = vmatprep.mubr.msk.bf16.mxu1 %vm1393_vm1, %v1392_v3 }
 0x302   :  { %1209 = vmatprep.subr.bf16.mxu1 %v1392_v3 }
 0x305   :  { %1210 = vmatpush3.bf16.msra.mxu1 %v1651_v48 }
 0x306   :  { %1211 = vmatprep.subr.bf16.mxu1 %v1392_v3 }
 0x309   :  { %1212 = vmatpush3.bf16.msra.mxu1 %v1661_v51 }
 0x30a   :  { %1213 = vmatprep.subr.bf16.mxu1 %v1392_v3 }
 0x30d   :  { %1214 = vmatpush3.bf16.msra.mxu1 %v1670_v54 }
 0x30e   :  { %1237 = vmatprep.subr.bf16.mxu1 %v1392_v3 }
 0x3d3   :  { %v616_v29 = vpop.f32.mrb[12].mxu1 }
 0x3d4   :  { %v617_v9 = vadd.f32 %v616_v29, %v1678_v56  ;;  %v1205_v10 = vpop.f32.mrb[13].mxu1 }
 0x3d5   :  { %v619_v12 = vpop.f32.mrb[14].mxu1 }
 0x3d6   :  { %v629_v13 = vadd.f32 %v1090_v28, %v617_v9  ;;  %v620_v14 = vadd.f32 %v619_v12, %v1680_v57  ;;  %v1206_v15 = vpop.f32.mrb[15].mxu1  ;;  %v721_v12 = vstv %s1092_s22 }
 0x3d8   :  { %v631_v16 = vmul.f32 %v629_v13, %v629_v13  ;;  %v649_v17 = vadd.f32 %v629_v13, %v1687_v7  ;;  %v630_v18 = vadd.f32 %v1090_v28, %v620_v14 }
 0x3da   :  { %v633_v19 = vmul.f32 %v631_v16, %v629_v13  ;;  %v651_v20 = vmul.f32 %v649_v17, %v649_v17  ;;  %v632_v21 = vmul.f32 %v630_v18, %v630_v18  ;;  %v650_v22 = vadd.f32 %v630_v18, %v1690_v11 }
 0x3dc   :  { %v635_v23 = vmul.f32 0.044715, %v633_v19  ;;  %v653_v24 = vmul.f32 %v651_v20, %v649_v17  ;;  %v634_v25 = vmul.f32 %v632_v21, %v630_v18  ;;  %v652_v26 = vmul.f32 %v650_v22, %v650_v22 }
 0x3de   :  { %v637_v30 = vadd.f32 %v635_v23, %v629_v13  ;;  %v655_v31 = vmul.f32 0.044715, %v653_v24  ;;  %v636_v32 = vmul.f32 0.044715, %v634_v25  ;;  %v654_v33 = vmul.f32 %v652_v26, %v650_v22 }
 0x3e0   :  { %v639_v34 = vmul.f32 0.7978846, %v637_v30  ;;  %v657_v35 = vadd.f32 %v655_v31, %v649_v17  ;;  %v638_v36 = vadd.f32 %v636_v32, %v630_v18  ;;  %v656_v37 = vmul.f32 0.044715, %v654_v33 }
 0x3e2   :  { %1283 = vtanh.f32 %v639_v34  ;;  %v659_v38 = vmul.f32 0.7978846, %v657_v35  ;;  %v640_v39 = vmul.f32 0.7978846, %v638_v36  ;;  %v658_v40 = vadd.f32 %v656_v37, %v650_v22 }
 0x3e4   :  { %1285 = vtanh.f32 %v640_v39  ;;  %v660_v41 = vmul.f32 0.7978846, %v658_v40 }
 0x3e5   :  { %1287 = vtanh.f32 %v659_v38 }
 0x3e6   :  { %1289 = vtanh.f32 %v660_v41 }
 0x3ec   :  { %v1284_v42 = vpop.eup %1283 }
 0x3ed   :  { %v643_v43 = vadd.f32 1.0, %v1284_v42 }
 0x3ee   :  { %v1286_v44 = vpop.eup %1285 }
 0x3ef   :  { %v1288_v46 = vpop.eup %1287  ;;  %v644_v47 = vadd.f32 1.0, %v1286_v44  ;;  %v645_v50 = vmul.f32 0.5, %v643_v43 }
 0x3f0   :  { %v1290_v49 = vpop.eup %1289  ;;  %v663_v52 = vadd.f32 1.0, %v1288_v46 }
 0x3f1   :  { %v646_v53 = vmul.f32 0.5, %v644_v47  ;;  %v664_v55 = vadd.f32 1.0, %v1290_v49  ;;  %v647_v61 = vmul.f32 %v645_v50, %v629_v13 }
 0x3f2   :  { %v665_v59 = vmul.f32 0.5, %v663_v52 }
 0x3f3   :  { %v666_v60 = vmul.f32 0.5, %v664_v55  ;;  %v648_v63 = vmul.f32 %v646_v53, %v630_v18 }
 0x3f4   :  { %v667_v62 = vmul.f32 %v665_v59, %v649_v17 }
 0x3f5   :  { %v668_v0 = vmul.f32 %v666_v60, %v650_v22 }
 0x3f6   :  { %v669_v1 = vsub.f32 %v667_v62, %v647_v61 }
 0x3f7   :  { %v670_v2 = vsub.f32 %v668_v0, %v648_v63 }
 0x3f8   :  { %v671_v4 = vmul.f32 2.0, %v669_v1 }
 0x3f9   :  { %v672_v8 = vmul.f32 2.0, %v670_v2 }
 0x3fa   :  { %v673_v28 = vadd.f32 %v671_v4, %v647_v61 }
 0x3fb   :  { %v674_v29 = vadd.f32 %v672_v8, %v648_v63 }
 0x3fd   :  { %v675_v9 = vpack.c.bf16 %v674_v29, %v673_v28 }
 0x3ff   :  { %1216 = vmatmul.mubr.msk.bf16.vlgmr.msra.gmra.mrb[16].mxu1 %vm525_vm5, %v675_v9 }
 0x400   :  { %1238 = vmatpush3.bf16.msra.mxu1 %v1570_v27  ;;  %1239 = vmatprep.mubr.msk.bf16.mxu1 %vm1393_vm1, %v1392_v3 }
 0x401   :  { %1243 = vmatprep.subr.bf16.mxu1 %v1392_v3 }
 0x4d2   :  { %v713_v10 = vpop.f32.mrb[16].mxu1 }
 0x4d3   :  { %v714_v13 = vadd.f32 %v1701_v58, %v713_v10  ;;  %v1217_v14 = vpop.f32.mrb[17].mxu1 }
 0x4d4   :  { %v716_v15 = vpop.f32.mrb[18].mxu1 }
 0x4d5   :  { %v722_v16 = vmul.f32 %v721_v12, %v714_v13  ;;  %v717_v17 = vadd.f32 %v1701_v58, %v716_v15  ;;  %v1218_v18 = vpop.f32.mrb[19].mxu1 }
 0x4d7   :  { %v723_v19 = vmul.f32 %v721_v12, %v717_v17  ;;  %v1739_v20 = vadd.f32 %v722_v16, %v1706_v5  ;;  %v1095_v5 = vld [vmem:[%s1873_s12 + $0x2] ss:$0 sm:$0xff] }
 0x4d9   :  { %v1742_v27 = vadd.f32 %v723_v19, %v1709_v6 }
 0x4db   :  { %v728_v21 = vpack.c.bf16 %v1742_v27, %v1739_v20 }
 0x4dd   :  { %1222 = vmatmul.mubr.msk.bf16.vlgmr.msra.gmra.mrb[12].mxu0 %vm357_vm3, %v728_v21 }
 0x4de   :  { %1226 = vmatpush3.bf16.msra.mxu0 %v1641_v45  ;;  %1233 = vmatprep.mubr.msk.bf16.mxu0 %vm1393_vm1, %v1392_v3 }
 0x4df   :  { %1227 = vmatprep.subr.bf16.mxu0 %v1392_v3 }
 0x4e2   :  { %1228 = vmatpush3.bf16.msra.mxu0 %v1651_v48 }
 0x4e3   :  { %1229 = vmatprep.subr.bf16.mxu0 %v1392_v3 }
 0x4e6   :  { %1230 = vmatpush3.bf16.msra.mxu0 %v1661_v51 }
 0x4e7   :  { %1231 = vmatprep.subr.bf16.mxu0 %v1392_v3 }
 0x4ea   :  { %1232 = vmatpush3.bf16.msra.mxu0 %v1670_v54 }
 0x5b0   :  { %v766_v6 = vpop.f32.mrb[12].mxu0 }
 0x5b1   :  { %v767_v22 = vadd.f32 %v766_v6, %v1678_v56  ;;  %v1223_v23 = vpop.f32.mrb[13].mxu0 }
 0x5b2   :  { %v769_v24 = vpop.f32.mrb[14].mxu0  ;;  %v871_v23 = vstv %s1097_s5 }
 0x5b3   :  { %v779_v25 = vadd.f32 %v1095_v5, %v767_v22  ;;  %v770_v26 = vadd.f32 %v769_v24, %v1680_v57  ;;  %v1224_v30 = vpop.f32.mrb[15].mxu0 }
 0x5b5   :  { %v781_v31 = vmul.f32 %v779_v25, %v779_v25  ;;  %v799_v32 = vadd.f32 %v779_v25, %v1687_v7  ;;  %v780_v33 = vadd.f32 %v1095_v5, %v770_v26 }
 0x5b7   :  { %v783_v34 = vmul.f32 %v781_v31, %v779_v25  ;;  %v801_v35 = vmul.f32 %v799_v32, %v799_v32  ;;  %v782_v36 = vmul.f32 %v780_v33, %v780_v33  ;;  %v800_v37 = vadd.f32 %v780_v33, %v1690_v11 }
 0x5b9   :  { %v785_v38 = vmul.f32 0.044715, %v783_v34  ;;  %v803_v39 = vmul.f32 %v801_v35, %v799_v32  ;;  %v784_v40 = vmul.f32 %v782_v36, %v780_v33  ;;  %v802_v41 = vmul.f32 %v800_v37, %v800_v37 }
 0x5bb   :  { %v787_v42 = vadd.f32 %v785_v38, %v779_v25  ;;  %v805_v43 = vmul.f32 0.044715, %v803_v39  ;;  %v786_v44 = vmul.f32 0.044715, %v784_v40  ;;  %v804_v46 = vmul.f32 %v802_v41, %v800_v37 }
 0x5bd   :  { %v789_v47 = vmul.f32 0.7978846, %v787_v42  ;;  %v807_v49 = vadd.f32 %v805_v43, %v799_v32  ;;  %v788_v50 = vadd.f32 %v786_v44, %v780_v33  ;;  %v806_v52 = vmul.f32 0.044715, %v804_v46 }
 0x5bf   :  { %1291 = vtanh.f32 %v789_v47  ;;  %v809_v53 = vmul.f32 0.7978846, %v807_v49  ;;  %v790_v55 = vmul.f32 0.7978846, %v788_v50  ;;  %v808_v59 = vadd.f32 %v806_v52, %v800_v37 }
 0x5c1   :  { %1293 = vtanh.f32 %v790_v55  ;;  %v810_v60 = vmul.f32 0.7978846, %v808_v59 }
 0x5c2   :  { %1295 = vtanh.f32 %v809_v53 }
 0x5c3   :  { %1297 = vtanh.f32 %v810_v60 }
 0x5c9   :  { %v1292_v61 = vpop.eup %1291 }
 0x5ca   :  { %v793_v62 = vadd.f32 1.0, %v1292_v61 }
 0x5cb   :  { %v1294_v63 = vpop.eup %1293 }
 0x5cc   :  { %v1296_v0 = vpop.eup %1295  ;;  %v794_v1 = vadd.f32 1.0, %v1294_v63  ;;  %v795_v4 = vmul.f32 0.5, %v793_v62 }
 0x5cd   :  { %v1298_v2 = vpop.eup %1297  ;;  %v813_v8 = vadd.f32 1.0, %v1296_v0 }
 0x5ce   :  { %v796_v28 = vmul.f32 0.5, %v794_v1  ;;  %v814_v29 = vadd.f32 1.0, %v1298_v2  ;;  %v797_v12 = vmul.f32 %v795_v4, %v779_v25 }
 0x5cf   :  { %v815_v9 = vmul.f32 0.5, %v813_v8 }
 0x5d0   :  { %v816_v10 = vmul.f32 0.5, %v814_v29  ;;  %v798_v14 = vmul.f32 %v796_v28, %v780_v33 }
 0x5d1   :  { %v817_v13 = vmul.f32 %v815_v9, %v799_v32 }
 0x5d2   :  { %v818_v15 = vmul.f32 %v816_v10, %v800_v37 }
 0x5d3   :  { %v819_v16 = vsub.f32 %v817_v13, %v797_v12 }
 0x5d4   :  { %v820_v17 = vsub.f32 %v818_v15, %v798_v14 }
 0x5d5   :  { %v821_v18 = vmul.f32 2.0, %v819_v16 }
 0x5d6   :  { %v822_v19 = vmul.f32 2.0, %v820_v17 }
 0x5d7   :  { %v823_v21 = vadd.f32 %v821_v18, %v797_v12 }
 0x5d8   :  { %v824_v5 = vadd.f32 %v822_v19, %v798_v14 }
 0x5da   :  { %v825_v6 = vpack.c.bf16 %v824_v5, %v823_v21 }
 0x5dc   :  { %1234 = vmatmul.mubr.msk.bf16.vlgmr.msra.gmra.mrb[16].mxu0 %vm525_vm5, %v825_v6 }
 0x6af   :  { %v863_v22 = vpop.f32.mrb[16].mxu0 }
 0x6b0   :  { %v864_v24 = vadd.f32 %v1701_v58, %v863_v22  ;;  %v1235_v26 = vpop.f32.mrb[17].mxu0 }
 0x6b1   :  { %v866_v30 = vpop.f32.mrb[18].mxu0 }
 0x6b2   :  { %v872_v25 = vmul.f32 %v871_v23, %v864_v24  ;;  %v867_v31 = vadd.f32 %v1701_v58, %v866_v30  ;;  %v1236_v32 = vpop.f32.mrb[19].mxu0 }
 0x6b4   :  { %v873_v33 = vmul.f32 %v871_v23, %v867_v31  ;;  %v1767_v34 = vadd.f32 %v872_v25, %v1739_v20  ;;  %v1100_v20 = vld [vmem:[%s1873_s12 + $0x3] ss:$0 sm:$0xff] }
 0x6b6   :  { %v1770_v35 = vadd.f32 %v873_v33, %v1742_v27 }
 0x6b8   :  { %v878_v36 = vpack.c.bf16 %v1770_v35, %v1767_v34 }
 0x6ba   :  { %1240 = vmatmul.mubr.msk.bf16.vlgmr.msra.gmra.mrb[20].mxu1 %vm357_vm3, %v878_v36 }
 0x6bb   :  { %1244 = vmatpush3.bf16.msra.mxu1 %v1641_v45  ;;  %1251 = vmatprep.mubr.msk.bf16.mxu1 %vm1393_vm1, %v1392_v3 }
 0x6bc   :  { %1245 = vmatprep.subr.bf16.mxu1 %v1392_v3 }
 0x6bf   :  { %1246 = vmatpush3.bf16.msra.mxu1 %v1651_v48 }
 0x6c0   :  { %1247 = vmatprep.subr.bf16.mxu1 %v1392_v3 }
 0x6c3   :  { %1248 = vmatpush3.bf16.msra.mxu1 %v1661_v51 }
 0x6c4   :  { %1249 = vmatprep.subr.bf16.mxu1 %v1392_v3 }
 0x6c7   :  { %1250 = vmatpush3.bf16.msra.mxu1 %v1670_v54 }
 0x78d   :  { %v916_v45 = vpop.f32.mrb[20].mxu1 }
 0x78e   :  { %v917_v27 = vadd.f32 %v916_v45, %v1678_v56  ;;  %v1241_v37 = vpop.f32.mrb[21].mxu1 }
 0x78f   :  { %v919_v38 = vpop.f32.mrb[22].mxu1 }
 0x790   :  { %v929_v39 = vadd.f32 %v1100_v20, %v917_v27  ;;  %v920_v48 = vadd.f32 %v919_v38, %v1680_v57  ;;  %v1242_v40 = vpop.f32.mrb[23].mxu1 }
 0x792   :  { %v931_v41 = vmul.f32 %v929_v39, %v929_v39  ;;  %v949_v51 = vadd.f32 %v929_v39, %v1687_v7  ;;  %v930_v42 = vadd.f32 %v1100_v20, %v920_v48 }
 0x794   :  { %v933_v3 = vmul.f32 %v931_v41, %v929_v39  ;;  %v951_v43 = vmul.f32 %v949_v51, %v949_v51  ;;  %v932_v54 = vmul.f32 %v930_v42, %v930_v42  ;;  %v950_v44 = vadd.f32 %v930_v42, %v1690_v11 }
 0x796   :  { %v935_v46 = vmul.f32 0.044715, %v933_v3  ;;  %v953_v47 = vmul.f32 %v951_v43, %v949_v51  ;;  %v934_v49 = vmul.f32 %v932_v54, %v930_v42  ;;  %v952_v50 = vmul.f32 %v950_v44, %v950_v44 }
 0x798   :  { %v937_v56 = vadd.f32 %v935_v46, %v929_v39  ;;  %v955_v52 = vmul.f32 0.044715, %v953_v47  ;;  %v936_v53 = vmul.f32 0.044715, %v934_v49  ;;  %v954_v55 = vmul.f32 %v952_v50, %v950_v44 }
 0x79a   :  { %v939_v59 = vmul.f32 0.7978846, %v937_v56  ;;  %v957_v57 = vadd.f32 %v955_v52, %v949_v51  ;;  %v938_v60 = vadd.f32 %v936_v53, %v930_v42  ;;  %v956_v61 = vmul.f32 0.044715, %v954_v55 }
 0x79c   :  { %1299 = vtanh.f32 %v939_v59  ;;  %v959_v7 = vmul.f32 0.7978846, %v957_v57  ;;  %v940_v62 = vmul.f32 0.7978846, %v938_v60  ;;  %v958_v63 = vadd.f32 %v956_v61, %v950_v44 }
 0x79e   :  { %1301 = vtanh.f32 %v940_v62  ;;  %v960_v0 = vmul.f32 0.7978846, %v958_v63 }
 0x79f   :  { %1303 = vtanh.f32 %v959_v7 }
 0x7a0   :  { %1305 = vtanh.f32 %v960_v0 }
 0x7a6   :  { %v1300_v11 = vpop.eup %1299 }
 0x7a7   :  { %v943_v1 = vadd.f32 1.0, %v1300_v11 }
 0x7a8   :  { %v1302_v2 = vpop.eup %1301 }
 0x7a9   :  { %v1304_v4 = vpop.eup %1303  ;;  %v944_v8 = vadd.f32 1.0, %v1302_v2  ;;  %v945_v29 = vmul.f32 0.5, %v943_v1 }
 0x7aa   :  { %v1306_v28 = vpop.eup %1305  ;;  %v963_v9 = vadd.f32 1.0, %v1304_v4 }
 0x7ab   :  { %v946_v10 = vmul.f32 0.5, %v944_v8  ;;  %v964_v12 = vadd.f32 1.0, %v1306_v28  ;;  %v947_v15 = vmul.f32 %v945_v29, %v929_v39 }
 0x7ac   :  { %v965_v13 = vmul.f32 0.5, %v963_v9 }
 0x7ad   :  { %v966_v14 = vmul.f32 0.5, %v964_v12  ;;  %v948_v17 = vmul.f32 %v946_v10, %v930_v42 }
 0x7ae   :  { %v967_v16 = vmul.f32 %v965_v13, %v949_v51 }
 0x7af   :  { %v968_v18 = vmul.f32 %v966_v14, %v950_v44 }
 0x7b0   :  { %v969_v19 = vsub.f32 %v967_v16, %v947_v15 }
 0x7b1   :  { %v970_v21 = vsub.f32 %v968_v18, %v948_v17 }
 0x7b2   :  { %v971_v5 = vmul.f32 2.0, %v969_v19 }
 0x7b3   :  { %v972_v6 = vmul.f32 2.0, %v970_v21 }
 0x7b4   :  { %v973_v22 = vadd.f32 %v971_v5, %v947_v15 }
 0x7b5   :  { %v974_v23 = vadd.f32 %v972_v6, %v948_v17 }
 0x7b7   :  { %v975_v24 = vpack.c.bf16 %v974_v23, %v973_v22 }
 0x7b9   :  { %1252 = vmatmul.mubr.msk.bf16.vlgmr.msra.gmra.mrb[24].mxu1 %vm525_vm5, %v975_v24 }
 0x7ba   :  { %1330 = shalt.err (!%p1327_p9)
}
 0x7bb   :  { %s1331_s3 = scalar_lea.hbm %s1861_s18, 256 }
 0x7bc   :  { %p1332_p10 = scmp.ne.s32.totalorder %s1861_s18, %s1331_s3  ;;  %p1335_p11 = scmp.lt.u32.totalorder %s1331_s3, %s1861_s18 }
 0x7be   :  { %p1337_p12 = pnand %p1335_p11, %p1332_p10 }
 0x7c0   :  { %1340 = shalt.err (!%p1337_p12)
}
 0x7c1   :  { %s1395_s13 = smov 128   ;;  %s1396_s0 = smov 8  }
 0x7c2   :  { %1051 = dma.vmem_to_hbm [thread:$0]  %s1046_s10, 256, %s1861_s18, [#allocation7], %s1395_s13, %s1395_s13, %s1396_s0  }
 0x7c3   :  { %s1397_s15 = smov [#allocation8]  }
 0x7c4   :  { %s1057_s9 = sshll.u32 %s1397_s15, 4  ;;  %s1058_s9 = int_to_ptr.vmem [resolvable:$true] %s1057_s9 }
 0x7c5   :  { %s1341_s12 = scalar_lea.vmem %s1058_s9, 256  ;;  %p1346_p0 = scmp.lt.s32.totalorder %s1058_s9, %s1058_s9 }
 0x7c6   :  { %p1342_p13 = scmp.ne.s32.totalorder %s1058_s9, %s1341_s12  ;;  %p1347_p1 = scmp.lt.s32.totalorder %s1341_s12, %s1341_s12 }
 0x7c8   :  { %p1348_p2 = por %p1347_p1, %p1346_p0 }
 0x7ca   :  { %p1349_p3 = pnand %p1348_p2, %p1342_p13 }
 0x7cc   :  { %1352 = shalt.err (!%p1349_p3)
}
 0x7cd   :  { %s1353_s21 = scalar_lea.hbm %s1862_s19, 256 }
 0x7ce   :  { %p1354_p4 = scmp.ne.s32.totalorder %s1862_s19, %s1353_s21  ;;  %p1357_p5 = scmp.lt.u32.totalorder %s1353_s21, %s1862_s19 }
 0x7d0   :  { %p1359_p6 = pnand %p1357_p5, %p1354_p4 }
 0x7d2   :  { %1362 = shalt.err (!%p1359_p6)
}
 0x7d3   :  { %1063 = dma.vmem_to_hbm [thread:$0]  %s1058_s9, 256, %s1862_s19, [#allocation7], %s1395_s13, %s1395_s13, %s1396_s0  }
 0x7d4   :  { %s1102_s5 = sld [smem:[#allocation2 + $0x3]]  ;;  %s1398_s2 = smov [#allocation5]  }
 0x7d5   :  { %s1033_s8 = sshll.u32 %s1398_s2, 4  ;;  %s1034_s8 = int_to_ptr.vmem [resolvable:$true] %s1033_s8 }
 0x7d6   :  { %s1363_s19 = scalar_lea.vmem %s1034_s8, 256  ;;  %p1368_p8 = scmp.lt.s32.totalorder %s1034_s8, %s1034_s8 }
 0x7d7   :  { %p1364_p7 = scmp.ne.s32.totalorder %s1034_s8, %s1363_s19  ;;  %p1369_p9 = scmp.lt.s32.totalorder %s1363_s19, %s1363_s19 }
 0x7d9   :  { %p1370_p10 = por %p1369_p9, %p1368_p8 }
 0x7da   :  { %v1021_v30 = vstv %s1102_s5 }
 0x7db   :  { %p1371_p11 = pnand %p1370_p10, %p1364_p7 }
 0x88c   :  { %v1013_v26 = vpop.f32.mrb[24].mxu1 }
 0x88d   :  { %v1014_v25 = vadd.f32 %v1701_v58, %v1013_v26  ;;  %v1253_v31 = vpop.f32.mrb[25].mxu1 }
 0x88e   :  { %v1016_v32 = vpop.f32.mrb[26].mxu1 }
 0x88f   :  { %v1022_v33 = vmul.f32 %v1021_v30, %v1014_v25  ;;  %v1017_v36 = vadd.f32 %v1701_v58, %v1016_v32  ;;  %v1254_v20 = vpop.f32.mrb[27].mxu1 }
 0x891   :  { %v1024_v45 = vadd.f32 %v1022_v33, %v1767_v34  ;;  %v1023_v27 = vmul.f32 %v1021_v30, %v1017_v36 }
 0x893   :  { %1026 = vst.msk [vmem:[#allocation5] sm:$0xff] %vm357_vm3, %v1024_v45  ;;  %v1025_v37 = vadd.f32 %v1023_v27, %v1770_v35 }
 0x895   :  { %1027 = vst.msk [vmem:[#allocation5 + $0x8] sm:$0xff] %vm357_vm3, %v1025_v37 }
 0x896   :  { %1374 = shalt.err (!%p1371_p11)
}
 0x897   :  { %s1375_s24 = scalar_lea.hbm %s1860_s17, 256 }
 0x898   :  { %p1376_p12 = scmp.ne.s32.totalorder %s1860_s17, %s1375_s24  ;;  %p1379_p13 = scmp.lt.u32.totalorder %s1375_s24, %s1860_s17 }
 0x89a   :  { %p1381_p0 = pnand %p1379_p13, %p1376_p12 }
 0x89c   :  { %1384 = shalt.err (!%p1381_p0)
}
 0x89d   :  { %1039 = dma.vmem_to_hbm [thread:$0]  %s1034_s8, 256, %s1860_s17, [#allocation3], %s1395_s13, %s1395_s13, %s1396_s0  }
 0x89e   :  { %1387 = dma.done.wait [#allocation3], 256  }
 0x89f   :  { %1388 = vsyncadd [#allocation3], 4294967040 }
 0x8a0   :  { %1389 = dma.done.wait [#allocation7], 512  }
 0x8a1   :  { %1390 = vsyncadd [#allocation7], 4294966784 }
 0x8a2   :  { %1073 = vsyncpa [#allocation3], 1 }
 0x8a3   :  { %1074 = vsyncpa [#allocation7], 1 }
 0x8a4   :  { %1075 = vsyncpa [#allocation4], 1 }

</bundles_post_ra>
